<compile_context>
chip_gen: v6e
topology: v6e:2x2x1
jax: 0.10.0
libtpu: 0.0.40
codegen_flags: <defaults>
</compile_context>

<pallas_src>
import functools

import jax
import jax.numpy as jnp
from jax import lax
from jax.experimental import pallas as pl
from jax.experimental.pallas import tpu as pltpu


def _opt_attention_kernel(hq_ref, hkv_ref, pad_ref,
                          wq_ref, bq_ref, wkv_ref, bkv_ref, wo_ref, bo_ref,
                          out_ref, *maybe_attnw,
                          num_heads, head_dim, q_block, causal,
                          compute_dtype, output_attentions):
    attnw_ref = maybe_attnw[0] if output_attentions else None

    qi = pl.program_id(1)
    neg = jnp.finfo(jnp.float32).min
    E = num_heads * head_dim

    x_q = hq_ref[0]                      # (Tq, E)  compute_dtype
    x_kv = hkv_ref[0]                    # (S,  E)  compute_dtype
    Tq = x_q.shape[0]
    S = x_kv.shape[0]

    # Fused full-width projections (scaling already folded into wq/bq).
    q_all = jnp.dot(x_q, wq_ref[...],
                    preferred_element_type=jnp.float32) + bq_ref[...]       # (Tq, E)
    kv_all = jnp.dot(x_kv, wkv_ref[...],
                     preferred_element_type=jnp.float32) + bkv_ref[...]     # (S, 2E)

    # Additive bias: key-padding row (streamed, (1,S)) + in-kernel causal mask.
    bias = pad_ref[0, 0]                                                    # (1, S) f32
    if causal:
        q_pos = qi * q_block + lax.broadcasted_iota(jnp.int32, (Tq, S), 0)
        k_pos = lax.broadcasted_iota(jnp.int32, (Tq, S), 1)
        bias = bias + jnp.where(k_pos <= q_pos, 0.0, neg)                   # (Tq, S)

    ctx_parts = []
    for h in range(num_heads):           # static unroll; H is a compile-time constant
        lo = h * head_dim
        q_h = q_all[:, lo:lo + head_dim].astype(compute_dtype)              # (Tq, D)
        k_h = kv_all[:, lo:lo + head_dim].astype(compute_dtype)             # (S,  D)
        v_h = kv_all[:, E + lo:E + lo + head_dim].astype(compute_dtype)     # (S,  D)

        # scores[t, s] = sum_d q[t, d] * k[s, d]  (no in-kernel transpose)
        scores = lax.dot_general(q_h, k_h, (((1,), (1,)), ((), ())),
                                 preferred_element_type=jnp.float32)        # (Tq, S)
        scores = jnp.maximum(scores + bias, neg)                            # clamp (ref)

        # f32 softmax over keys.
        m = jnp.max(scores, axis=-1, keepdims=True)
        e = jnp.exp(scores - m)
        denom = jnp.sum(e, axis=-1, keepdims=True)
        if output_attentions:
            probs = e / denom                         # exact: rows sum to 1 like torch
            attnw_ref[0, h] = probs.astype(attnw_ref.dtype)
        else:
            probs = e * pl.reciprocal(denom, approx=True)   # EUP slot, ~free

        ctx_parts.append(jnp.dot(probs.astype(compute_dtype), v_h,
                                 preferred_element_type=jnp.float32))       # (Tq, D)

    ctx = jnp.concatenate(ctx_parts, axis=-1)                               # (Tq, E) f32
    out = jnp.dot(ctx.astype(compute_dtype), wo_ref[...],
                  preferred_element_type=jnp.float32) + bo_ref[...]
    out_ref[0] = out.astype(out_ref.dtype)


def _pick_q_block(T):
    if T <= 512:
        return T
    for cand in (512, 384, 256, 128):
        if T % cand == 0:
            return cand
    return T


def _vmem_limit_bytes():
    # Re-derive per generation (v7x has 64 MiB physical vs 128 MiB on v5e/v6e).
    try:
        info = pltpu.get_tpu_info()
        cap = getattr(info, "vmem_capacity_bytes", None)
        if cap:
            return min(int(cap) * 3 // 4, 96 * 1024 * 1024)
    except Exception:
        pass
    return 32 * 1024 * 1024


def opt_attention_forward(hidden_states, params, num_heads, *,
                          key_padding_mask=None, causal=True,
                          output_attentions=False,
                          compute_dtype=jnp.bfloat16, q_block=None):
    """OPTAttention forward (empty KV cache).

    hidden_states: (B, T, E); key_padding_mask: optional additive (B, 1, 1, T) f32.
    Returns (attn_output, attn_weights or None).
    """
    B, T, E = hidden_states.shape
    H = num_heads
    D = E // H
    assert H * D == E
    scaling = D ** (-0.5)
    out_dtype = hidden_states.dtype

    if q_block is None:
        q_block = _pick_q_block(T)
    assert T % q_block == 0
    n_q = T // q_block

    wq, bq = params['q_proj']
    wk, bk = params['k_proj']
    wv, bv = params['v_proj']
    wo, bo = params['out_proj']

    # Host-side weight prep (once): pre-transpose, fold scaling into q, fuse K/V.
    wq_p = (wq.T * scaling).astype(compute_dtype)                       # (E, E)
    bq_p = (bq * scaling).reshape(1, E).astype(jnp.float32)
    wkv_p = jnp.concatenate([wk.T, wv.T], axis=1).astype(compute_dtype)  # (E, 2E)
    bkv_p = jnp.concatenate([bk, bv]).reshape(1, 2 * E).astype(jnp.float32)
    wo_p = wo.T.astype(compute_dtype)                                   # (E, E)
    bo_p = bo.reshape(1, E).astype(jnp.float32)

    hs = hidden_states.astype(compute_dtype)
    if key_padding_mask is None:
        key_padding_mask = jnp.zeros((B, 1, 1, T), jnp.float32)
    else:
        key_padding_mask = key_padding_mask.astype(jnp.float32)

    kernel = functools.partial(
        _opt_attention_kernel,
        num_heads=H, head_dim=D, q_block=q_block, causal=causal,
        compute_dtype=compute_dtype, output_attentions=output_attentions)

    const2 = lambda b, qi: (0, 0)
    in_specs = [
        pl.BlockSpec((1, q_block, E), lambda b, qi: (b, qi, 0)),    # hidden (q tile)
        pl.BlockSpec((1, T, E), lambda b, qi: (b, 0, 0)),           # hidden (keys/values)
        pl.BlockSpec((1, 1, 1, T), lambda b, qi: (b, 0, 0, 0)),     # key-padding row
        pl.BlockSpec((E, E), const2),                               # W_q (resident)
        pl.BlockSpec((1, E), const2),                               # b_q
        pl.BlockSpec((E, 2 * E), const2),                           # W_kv fused
        pl.BlockSpec((1, 2 * E), const2),                           # b_kv fused
        pl.BlockSpec((E, E), const2),                               # W_o
        pl.BlockSpec((1, E), const2),                               # b_o
    ]

    out_shapes = [jax.ShapeDtypeStruct((B, T, E), out_dtype)]
    out_specs = [pl.BlockSpec((1, q_block, E), lambda b, qi: (b, qi, 0))]
    if output_attentions:
        # Stored in the hidden dtype (matches torch `.to(query_states.dtype)`).
        # TODO(synk): for real sequence lengths pad T to a multiple of 128 so
        # this store is a lane-dense unmasked vst.
        out_shapes.append(jax.ShapeDtypeStruct((B, H, T, T), out_dtype))
        out_specs.append(pl.BlockSpec((1, H, q_block, T),
                                      lambda b, qi: (b, 0, qi, 0)))

    results = pl.pallas_call(
        kernel,
        out_shape=tuple(out_shapes),
        grid_spec=pltpu.PrefetchScalarGridSpec(
            num_scalar_prefetch=0,
            grid=(B, n_q),
            in_specs=in_specs,
            out_specs=tuple(out_specs),
            scratch_shapes=[],
        ),
        compiler_params=pltpu.CompilerParams(
            # TODO(synk): on v7x mark one axis CORE_PARALLEL to split across
            # both TensorCores.
            dimension_semantics=("parallel", "parallel"),
            vmem_limit_bytes=_vmem_limit_bytes(),
        ),
    )(hs, hs, key_padding_mask, wq_p, bq_p, wkv_p, bkv_p, wo_p, bo_p)

    if output_attentions:
        attn_output, attn_weights = results
        return attn_output, attn_weights
    attn_output = results[0] if isinstance(results, (tuple, list)) else results
    return attn_output, None


def _reference(hidden_states, attention_mask, params, num_heads):
    """Pure-JAX f32 reference mirroring the PyTorch forward (empty KV cache)."""
    B, T, E = hidden_states.shape
    D = E // num_heads
    scaling = D ** (-0.5)
    wq, bq = params['q_proj']
    wk, bk = params['k_proj']
    wv, bv = params['v_proj']
    wo, bo = params['out_proj']

    q = (hidden_states @ wq.T + bq) * scaling
    k = hidden_states @ wk.T + bk
    v = hidden_states @ wv.T + bv

    def shape(x):  # (B,T,E) -> (B,H,T,D)
        return x.reshape(B, T, num_heads, D).transpose(0, 2, 1, 3)

    q, k, v = shape(q), shape(k), shape(v)
    scores = jnp.einsum('bhtd,bhsd->bhts', q, k)
    scores = scores + attention_mask
    scores = jnp.maximum(scores, jnp.finfo(scores.dtype).min)
    probs = jax.nn.softmax(scores.astype(jnp.float32), axis=-1)
    ctx = jnp.einsum('bhts,bhsd->bhtd', probs, v)
    ctx = ctx.transpose(0, 2, 1, 3).reshape(B, T, E)
    out = ctx @ wo.T + bo
    return out, probs


def init_params(key, embed_dim):
    ks = jax.random.split(key, 8)

    def linear(kw, kb):
        w = jax.random.normal(kw, (embed_dim, embed_dim), jnp.float32) * 0.02
        b = jax.random.normal(kb, (embed_dim,), jnp.float32) * 0.02
        return w, b

    return {
        'q_proj': linear(ks[0], ks[1]),
        'k_proj': linear(ks[2], ks[3]),
        'v_proj': linear(ks[4], ks[5]),
        'out_proj': linear(ks[6], ks[7]),
    }


if __name__ == "__main__":
    B, T, E, H = 2, 8, 32, 4

    key = jax.random.PRNGKey(0)
    k_params, k_hidden = jax.random.split(key)
    params = init_params(k_params, E)
    hidden = jax.random.normal(k_hidden, (B, T, E), jnp.float32)

    neg = jnp.finfo(jnp.float32).min
    # Key-padding additive row (mask out the last key of batch element 1).
    key_pad = jnp.zeros((B, 1, 1, T), jnp.float32).at[1, 0, 0, T - 1].set(neg)
    # Full (B,1,T,T) additive mask (causal + padding) for the pure-JAX reference,
    # same convention as HF OPT.
    causal = jnp.triu(jnp.full((T, T), neg, jnp.float32), k=1)
    full_mask = causal[None, None, :, :] + key_pad

    ref_out, ref_w = _reference(hidden, full_mask, params, H)

    # Path 1: f32 MXU operands, attention weights emitted (exact softmax divide).
    attn_out, attn_w = opt_attention_forward(
        hidden, params, H, key_padding_mask=key_pad, causal=True,
        output_attentions=True, compute_dtype=jnp.float32)
    jax.block_until_ready(attn_out)
    jax.block_until_ready(attn_w)
    assert jnp.allclose(attn_out, ref_out, atol=5e-3, rtol=5e-3)
    assert jnp.allclose(attn_w.astype(jnp.float32), ref_w, atol=5e-3, rtol=5e-3)

    # Path 2 (fast, default): bf16 MXU operands, f32 accumulation/softmax,
    # approx reciprocal, no attn-weights writeback.
    fast_out, none_w = opt_attention_forward(
        hidden, params, H, key_padding_mask=key_pad, causal=True,
        output_attentions=False)
    jax.block_until_ready(fast_out)
    assert none_w is None
    assert jnp.allclose(fast_out.astype(jnp.float32), ref_out, atol=5e-2, rtol=5e-2)

    # TODO(synk): stateful KVCache concat/update (past_key_value) has no
    # in-kernel equivalent; cache starts empty so semantics match.
    # TODO(synk): for very long sequences add flash-style key tiling (online
    # softmax) so the (Tq,S) scores never cover the full key axis; for very
    # large E (OPT-6.7b+) switch resident full weights back to head-group
    # blocked weights to stay under VMEM.
    print("KERNEL_OK")
</pallas_src>

<mosaic_0001>
module attributes {stable_mosaic.version = 11 : i64} {
  func.func @_opt_attention_kernel(%arg0: i32, %arg1: i32, %arg2: memref<1x8x32xf32, #tpu.memory_space<vmem>>, %arg3: memref<1x8x32xf32, #tpu.memory_space<vmem>>, %arg4: memref<1x1x1x8xf32, #tpu.memory_space<vmem>>, %arg5: memref<32x32xf32, #tpu.memory_space<vmem>>, %arg6: memref<1x32xf32, #tpu.memory_space<vmem>>, %arg7: memref<32x64xf32, #tpu.memory_space<vmem>>, %arg8: memref<1x64xf32, #tpu.memory_space<vmem>>, %arg9: memref<32x32xf32, #tpu.memory_space<vmem>>, %arg10: memref<1x32xf32, #tpu.memory_space<vmem>>, %arg11: memref<1x8x32xf32, #tpu.memory_space<vmem>>, %arg12: memref<1x4x8x8xf32, #tpu.memory_space<vmem>>) attributes {dimension_semantics = [#tpu.dimension_semantics<parallel>, #tpu.dimension_semantics<parallel>], iteration_bounds = array<i64: 2, 1>, scalar_prefetch = 0 : i64, scratch_operands = 0 : i64, tpu.core_type = #tpu.core_type<tc>, window_params = [{transform_indices = @transform_0, window_bounds = array<i64: 1, 8, 32>}, {transform_indices = @transform_1, window_bounds = array<i64: 1, 8, 32>}, {transform_indices = @transform_2, window_bounds = array<i64: 1, 1, 1, 8>}, {pipeline_mode = #tpu.pipeline_mode<synchronous>, transform_indices = @transform_3, window_bounds = array<i64: 32, 32>}, {pipeline_mode = #tpu.pipeline_mode<synchronous>, transform_indices = @transform_4, window_bounds = array<i64: 1, 32>}, {pipeline_mode = #tpu.pipeline_mode<synchronous>, transform_indices = @transform_5, window_bounds = array<i64: 32, 64>}, {pipeline_mode = #tpu.pipeline_mode<synchronous>, transform_indices = @transform_6, window_bounds = array<i64: 1, 64>}, {pipeline_mode = #tpu.pipeline_mode<synchronous>, transform_indices = @transform_7, window_bounds = array<i64: 32, 32>}, {pipeline_mode = #tpu.pipeline_mode<synchronous>, transform_indices = @transform_8, window_bounds = array<i64: 1, 32>}, {transform_indices = @transform_9, window_bounds = array<i64: 1, 8, 32>}, {transform_indices = @transform_10, window_bounds = array<i64: 1, 4, 8, 8>}]} {
    %c0 = arith.constant 0 : index
    %c0_0 = arith.constant 0 : index
    %c0_1 = arith.constant 0 : index
    %0 = vector.load %arg2[%c0, %c0_0, %c0_1] : memref<1x8x32xf32, #tpu.memory_space<vmem>>, vector<1x8x32xf32>
    %1 = vector.shape_cast %0 : vector<1x8x32xf32> to vector<8x32xf32>
    %c0_2 = arith.constant 0 : index
    %c0_3 = arith.constant 0 : index
    %c0_4 = arith.constant 0 : index
    %2 = vector.load %arg3[%c0_2, %c0_3, %c0_4] : memref<1x8x32xf32, #tpu.memory_space<vmem>>, vector<1x8x32xf32>
    %3 = vector.shape_cast %2 : vector<1x8x32xf32> to vector<8x32xf32>
    %c0_5 = arith.constant 0 : index
    %c0_6 = arith.constant 0 : index
    %4 = vector.load %arg5[%c0_5, %c0_6] : memref<32x32xf32, #tpu.memory_space<vmem>>, vector<32x32xf32>
    %cst = arith.constant dense<0.000000e+00> : vector<8x32xf32>
    %5 = tpu.matmul %1, %4, %cst {dimension_numbers = #tpu.dot_dimension_numbers<[1], [0], [0], [1], [0, 0, 1, 1], [], []>} : vector<8x32xf32>, vector<32x32xf32>, vector<8x32xf32> -> vector<8x32xf32>
    %c0_7 = arith.constant 0 : index
    %c0_8 = arith.constant 0 : index
    %6 = vector.load %arg6[%c0_7, %c0_8] : memref<1x32xf32, #tpu.memory_space<vmem>>, vector<1x32xf32>
    %7 = vector.broadcast %6 : vector<1x32xf32> to vector<8x32xf32>
    %8 = arith.addf %5, %7 : vector<8x32xf32>
    %c0_9 = arith.constant 0 : index
    %c0_10 = arith.constant 0 : index
    %9 = vector.load %arg7[%c0_9, %c0_10] : memref<32x64xf32, #tpu.memory_space<vmem>>, vector<32x64xf32>
    %cst_11 = arith.constant dense<0.000000e+00> : vector<8x64xf32>
    %10 = tpu.matmul %3, %9, %cst_11 {dimension_numbers = #tpu.dot_dimension_numbers<[1], [0], [0], [1], [0, 0, 1, 1], [], []>} : vector<8x32xf32>, vector<32x64xf32>, vector<8x64xf32> -> vector<8x64xf32>
    %c0_12 = arith.constant 0 : index
    %c0_13 = arith.constant 0 : index
    %11 = vector.load %arg8[%c0_12, %c0_13] : memref<1x64xf32, #tpu.memory_space<vmem>>, vector<1x64xf32>
    %12 = vector.broadcast %11 : vector<1x64xf32> to vector<8x64xf32>
    %13 = arith.addf %10, %12 : vector<8x64xf32>
    %c0_14 = arith.constant 0 : index
    %c0_15 = arith.constant 0 : index
    %c0_16 = arith.constant 0 : index
    %c0_17 = arith.constant 0 : index
    %14 = vector.load %arg4[%c0_14, %c0_15, %c0_16, %c0_17] : memref<1x1x1x8xf32, #tpu.memory_space<vmem>>, vector<1x1x1x8xf32>
    %15 = vector.shape_cast %14 : vector<1x1x1x8xf32> to vector<1x8xf32>
    %c8_i32 = arith.constant 8 : i32
    %16 = arith.muli %arg1, %c8_i32 : i32
    %17 = tpu.iota {dimensions = array<i32: 0>} : vector<8x8xi32>
    %18 = vector.broadcast %16 : i32 to vector<8x8xi32>
    %19 = arith.addi %18, %17 : vector<8x8xi32>
    %20 = tpu.iota {dimensions = array<i32: 1>} : vector<8x8xi32>
    %21 = arith.cmpi sle, %20, %19 : vector<8x8xi32>
    %cst_18 = arith.constant 0.000000e+00 : f32
    %cst_19 = arith.constant -3.40282347E+38 : f32
    %22 = vector.broadcast %cst_18 : f32 to vector<8x8xf32>
    %23 = vector.broadcast %cst_19 : f32 to vector<8x8xf32>
    %24 = arith.select %21, %22, %23 : vector<8x8xi1>, vector<8x8xf32>
    %25 = vector.broadcast %15 : vector<1x8xf32> to vector<8x8xf32>
    %26 = arith.addf %25, %24 : vector<8x8xf32>
    %27 = vector.extract_strided_slice %8 {offsets = [0, 0], sizes = [8, 8], strides = [1, 1]} : vector<8x32xf32> to vector<8x8xf32>
    %28 = vector.extract_strided_slice %13 {offsets = [0, 0], sizes = [8, 8], strides = [1, 1]} : vector<8x64xf32> to vector<8x8xf32>
    %29 = vector.extract_strided_slice %13 {offsets = [0, 32], sizes = [8, 8], strides = [1, 1]} : vector<8x64xf32> to vector<8x8xf32>
    %cst_20 = arith.constant dense<0.000000e+00> : vector<8x8xf32>
    %30 = tpu.matmul %27, %28, %cst_20 {dimension_numbers = #tpu.dot_dimension_numbers<[1], [1], [0], [0], [0, 0, 1, 0], [], []>} : vector<8x8xf32>, vector<8x8xf32>, vector<8x8xf32> -> vector<8x8xf32>
    %31 = arith.addf %30, %26 : vector<8x8xf32>
    %cst_21 = arith.constant -3.40282347E+38 : f32
    %32 = vector.broadcast %cst_21 : f32 to vector<8x8xf32>
    %33 = arith.maximumf %31, %32 : vector<8x8xf32>
    %cst_22 = arith.constant dense<0xFF800000> : vector<8xf32>
    %34 = vector.multi_reduction <maximumf>, %33, %cst_22 [1] : vector<8x8xf32> to vector<8xf32>
    %35 = vector.shape_cast %34 : vector<8xf32> to vector<8x1xf32>
    %36 = vector.broadcast %35 : vector<8x1xf32> to vector<8x8xf32>
    %37 = arith.subf %33, %36 : vector<8x8xf32>
    %38 = math.exp %37 : vector<8x8xf32>
    %cst_23 = arith.constant dense<0.000000e+00> : vector<8xf32>
    %39 = vector.multi_reduction <add>, %38, %cst_23 [1] : vector<8x8xf32> to vector<8xf32>
    %40 = vector.shape_cast %39 : vector<8xf32> to vector<8x1xf32>
    %41 = vector.broadcast %40 : vector<8x1xf32> to vector<8x8xf32>
    %42 = arith.divf %38, %41 : vector<8x8xf32>
    %c0_24 = arith.constant 0 : index
    %c0_25 = arith.constant 0 : index
    %c0_26 = arith.constant 0 : index
    %c0_27 = arith.constant 0 : index
    %43 = vector.load %arg12[%c0_24, %c0_25, %c0_26, %c0_27] : memref<1x4x8x8xf32, #tpu.memory_space<vmem>>, vector<1x1x8x8xf32>
    %44 = vector.shape_cast %43 : vector<1x1x8x8xf32> to vector<8x8xf32>
    %45 = vector.shape_cast %42 : vector<8x8xf32> to vector<1x1x8x8xf32>
    tpu.vector_store %arg12[%c0_24, %c0_25, %c0_26, %c0_27], %45 {strides = array<i32>} : memref<1x4x8x8xf32, #tpu.memory_space<vmem>>, vector<1x1x8x8xf32>,
    %cst_28 = arith.constant dense<0.000000e+00> : vector<8x8xf32>
    %46 = tpu.matmul %42, %29, %cst_28 {dimension_numbers = #tpu.dot_dimension_numbers<[1], [0], [0], [1], [0, 0, 1, 1], [], []>} : vector<8x8xf32>, vector<8x8xf32>, vector<8x8xf32> -> vector<8x8xf32>
    %47 = vector.extract_strided_slice %8 {offsets = [0, 8], sizes = [8, 8], strides = [1, 1]} : vector<8x32xf32> to vector<8x8xf32>
    %48 = vector.extract_strided_slice %13 {offsets = [0, 8], sizes = [8, 8], strides = [1, 1]} : vector<8x64xf32> to vector<8x8xf32>
    %49 = vector.extract_strided_slice %13 {offsets = [0, 40], sizes = [8, 8], strides = [1, 1]} : vector<8x64xf32> to vector<8x8xf32>
    %cst_29 = arith.constant dense<0.000000e+00> : vector<8x8xf32>
    %50 = tpu.matmul %47, %48, %cst_29 {dimension_numbers = #tpu.dot_dimension_numbers<[1], [1], [0], [0], [0, 0, 1, 0], [], []>} : vector<8x8xf32>, vector<8x8xf32>, vector<8x8xf32> -> vector<8x8xf32>
    %51 = arith.addf %50, %26 : vector<8x8xf32>
    %cst_30 = arith.constant -3.40282347E+38 : f32
    %52 = vector.broadcast %cst_30 : f32 to vector<8x8xf32>
    %53 = arith.maximumf %51, %52 : vector<8x8xf32>
    %cst_31 = arith.constant dense<0xFF800000> : vector<8xf32>
    %54 = vector.multi_reduction <maximumf>, %53, %cst_31 [1] : vector<8x8xf32> to vector<8xf32>
    %55 = vector.shape_cast %54 : vector<8xf32> to vector<8x1xf32>
    %56 = vector.broadcast %55 : vector<8x1xf32> to vector<8x8xf32>
    %57 = arith.subf %53, %56 : vector<8x8xf32>
    %58 = math.exp %57 : vector<8x8xf32>
    %cst_32 = arith.constant dense<0.000000e+00> : vector<8xf32>
    %59 = vector.multi_reduction <add>, %58, %cst_32 [1] : vector<8x8xf32> to vector<8xf32>
    %60 = vector.shape_cast %59 : vector<8xf32> to vector<8x1xf32>
    %61 = vector.broadcast %60 : vector<8x1xf32> to vector<8x8xf32>
    %62 = arith.divf %58, %61 : vector<8x8xf32>
    %c0_33 = arith.constant 0 : index
    %c1 = arith.constant 1 : index
    %c0_34 = arith.constant 0 : index
    %c0_35 = arith.constant 0 : index
    %63 = vector.load %arg12[%c0_33, %c1, %c0_34, %c0_35] : memref<1x4x8x8xf32, #tpu.memory_space<vmem>>, vector<1x1x8x8xf32>
    %64 = vector.shape_cast %63 : vector<1x1x8x8xf32> to vector<8x8xf32>
    %65 = vector.shape_cast %62 : vector<8x8xf32> to vector<1x1x8x8xf32>
    tpu.vector_store %arg12[%c0_33, %c1, %c0_34, %c0_35], %65 {strides = array<i32>} : memref<1x4x8x8xf32, #tpu.memory_space<vmem>>, vector<1x1x8x8xf32>,
    %cst_36 = arith.constant dense<0.000000e+00> : vector<8x8xf32>
    %66 = tpu.matmul %62, %49, %cst_36 {dimension_numbers = #tpu.dot_dimension_numbers<[1], [0], [0], [1], [0, 0, 1, 1], [], []>} : vector<8x8xf32>, vector<8x8xf32>, vector<8x8xf32> -> vector<8x8xf32>
    %67 = vector.extract_strided_slice %8 {offsets = [0, 16], sizes = [8, 8], strides = [1, 1]} : vector<8x32xf32> to vector<8x8xf32>
    %68 = vector.extract_strided_slice %13 {offsets = [0, 16], sizes = [8, 8], strides = [1, 1]} : vector<8x64xf32> to vector<8x8xf32>
    %69 = vector.extract_strided_slice %13 {offsets = [0, 48], sizes = [8, 8], strides = [1, 1]} : vector<8x64xf32> to vector<8x8xf32>
    %cst_37 = arith.constant dense<0.000000e+00> : vector<8x8xf32>
    %70 = tpu.matmul %67, %68, %cst_37 {dimension_numbers = #tpu.dot_dimension_numbers<[1], [1], [0], [0], [0, 0, 1, 0], [], []>} : vector<8x8xf32>, vector<8x8xf32>, vector<8x8xf32> -> vector<8x8xf32>
    %71 = arith.addf %70, %26 : vector<8x8xf32>
    %cst_38 = arith.constant -3.40282347E+38 : f32
    %72 = vector.broadcast %cst_38 : f32 to vector<8x8xf32>
    %73 = arith.maximumf %71, %72 : vector<8x8xf32>
    %cst_39 = arith.constant dense<0xFF800000> : vector<8xf32>
    %74 = vector.multi_reduction <maximumf>, %73, %cst_39 [1] : vector<8x8xf32> to vector<8xf32>
    %75 = vector.shape_cast %74 : vector<8xf32> to vector<8x1xf32>
    %76 = vector.broadcast %75 : vector<8x1xf32> to vector<8x8xf32>
    %77 = arith.subf %73, %76 : vector<8x8xf32>
    %78 = math.exp %77 : vector<8x8xf32>
    %cst_40 = arith.constant dense<0.000000e+00> : vector<8xf32>
    %79 = vector.multi_reduction <add>, %78, %cst_40 [1] : vector<8x8xf32> to vector<8xf32>
    %80 = vector.shape_cast %79 : vector<8xf32> to vector<8x1xf32>
    %81 = vector.broadcast %80 : vector<8x1xf32> to vector<8x8xf32>
    %82 = arith.divf %78, %81 : vector<8x8xf32>
    %c0_41 = arith.constant 0 : index
    %c2 = arith.constant 2 : index
    %c0_42 = arith.constant 0 : index
    %c0_43 = arith.constant 0 : index
    %83 = vector.load %arg12[%c0_41, %c2, %c0_42, %c0_43] : memref<1x4x8x8xf32, #tpu.memory_space<vmem>>, vector<1x1x8x8xf32>
    %84 = vector.shape_cast %83 : vector<1x1x8x8xf32> to vector<8x8xf32>
    %85 = vector.shape_cast %82 : vector<8x8xf32> to vector<1x1x8x8xf32>
    tpu.vector_store %arg12[%c0_41, %c2, %c0_42, %c0_43], %85 {strides = array<i32>} : memref<1x4x8x8xf32, #tpu.memory_space<vmem>>, vector<1x1x8x8xf32>,
    %cst_44 = arith.constant dense<0.000000e+00> : vector<8x8xf32>
    %86 = tpu.matmul %82, %69, %cst_44 {dimension_numbers = #tpu.dot_dimension_numbers<[1], [0], [0], [1], [0, 0, 1, 1], [], []>} : vector<8x8xf32>, vector<8x8xf32>, vector<8x8xf32> -> vector<8x8xf32>
    %87 = vector.extract_strided_slice %8 {offsets = [0, 24], sizes = [8, 8], strides = [1, 1]} : vector<8x32xf32> to vector<8x8xf32>
    %88 = vector.extract_strided_slice %13 {offsets = [0, 24], sizes = [8, 8], strides = [1, 1]} : vector<8x64xf32> to vector<8x8xf32>
    %89 = vector.extract_strided_slice %13 {offsets = [0, 56], sizes = [8, 8], strides = [1, 1]} : vector<8x64xf32> to vector<8x8xf32>
    %cst_45 = arith.constant dense<0.000000e+00> : vector<8x8xf32>
    %90 = tpu.matmul %87, %88, %cst_45 {dimension_numbers = #tpu.dot_dimension_numbers<[1], [1], [0], [0], [0, 0, 1, 0], [], []>} : vector<8x8xf32>, vector<8x8xf32>, vector<8x8xf32> -> vector<8x8xf32>
    %91 = arith.addf %90, %26 : vector<8x8xf32>
    %cst_46 = arith.constant -3.40282347E+38 : f32
    %92 = vector.broadcast %cst_46 : f32 to vector<8x8xf32>
    %93 = arith.maximumf %91, %92 : vector<8x8xf32>
    %cst_47 = arith.constant dense<0xFF800000> : vector<8xf32>
    %94 = vector.multi_reduction <maximumf>, %93, %cst_47 [1] : vector<8x8xf32> to vector<8xf32>
    %95 = vector.shape_cast %94 : vector<8xf32> to vector<8x1xf32>
    %96 = vector.broadcast %95 : vector<8x1xf32> to vector<8x8xf32>
    %97 = arith.subf %93, %96 : vector<8x8xf32>
    %98 = math.exp %97 : vector<8x8xf32>
    %cst_48 = arith.constant dense<0.000000e+00> : vector<8xf32>
    %99 = vector.multi_reduction <add>, %98, %cst_48 [1] : vector<8x8xf32> to vector<8xf32>
    %100 = vector.shape_cast %99 : vector<8xf32> to vector<8x1xf32>
    %101 = vector.broadcast %100 : vector<8x1xf32> to vector<8x8xf32>
    %102 = arith.divf %98, %101 : vector<8x8xf32>
    %c0_49 = arith.constant 0 : index
    %c3 = arith.constant 3 : index
    %c0_50 = arith.constant 0 : index
    %c0_51 = arith.constant 0 : index
    %103 = vector.load %arg12[%c0_49, %c3, %c0_50, %c0_51] : memref<1x4x8x8xf32, #tpu.memory_space<vmem>>, vector<1x1x8x8xf32>
    %104 = vector.shape_cast %103 : vector<1x1x8x8xf32> to vector<8x8xf32>
    %105 = vector.shape_cast %102 : vector<8x8xf32> to vector<1x1x8x8xf32>
    tpu.vector_store %arg12[%c0_49, %c3, %c0_50, %c0_51], %105 {strides = array<i32>} : memref<1x4x8x8xf32, #tpu.memory_space<vmem>>, vector<1x1x8x8xf32>,
    %cst_52 = arith.constant dense<0.000000e+00> : vector<8x8xf32>
    %106 = tpu.matmul %102, %89, %cst_52 {dimension_numbers = #tpu.dot_dimension_numbers<[1], [0], [0], [1], [0, 0, 1, 1], [], []>} : vector<8x8xf32>, vector<8x8xf32>, vector<8x8xf32> -> vector<8x8xf32>
    %107 = tpu.concatenate %46, %66, %86, %106 in 1 : vector<8x8xf32>, vector<8x8xf32>, vector<8x8xf32>, vector<8x8xf32> -> vector<8x32xf32>
    %c0_53 = arith.constant 0 : index
    %c0_54 = arith.constant 0 : index
    %108 = vector.load %arg9[%c0_53, %c0_54] : memref<32x32xf32, #tpu.memory_space<vmem>>, vector<32x32xf32>
    %cst_55 = arith.constant dense<0.000000e+00> : vector<8x32xf32>
    %109 = tpu.matmul %107, %108, %cst_55 {dimension_numbers = #tpu.dot_dimension_numbers<[1], [0], [0], [1], [0, 0, 1, 1], [], []>} : vector<8x32xf32>, vector<32x32xf32>, vector<8x32xf32> -> vector<8x32xf32>
    %c0_56 = arith.constant 0 : index
    %c0_57 = arith.constant 0 : index
    %110 = vector.load %arg10[%c0_56, %c0_57] : memref<1x32xf32, #tpu.memory_space<vmem>>, vector<1x32xf32>
    %111 = vector.broadcast %110 : vector<1x32xf32> to vector<8x32xf32>
    %112 = arith.addf %109, %111 : vector<8x32xf32>
    %c0_58 = arith.constant 0 : index
    %c0_59 = arith.constant 0 : index
    %c0_60 = arith.constant 0 : index
    %113 = vector.load %arg11[%c0_58, %c0_59, %c0_60] : memref<1x8x32xf32, #tpu.memory_space<vmem>>, vector<1x8x32xf32>
    %114 = vector.shape_cast %113 : vector<1x8x32xf32> to vector<8x32xf32>
    %115 = vector.shape_cast %112 : vector<8x32xf32> to vector<1x8x32xf32>
    tpu.vector_store %arg11[%c0_58, %c0_59, %c0_60], %115 {strides = array<i32>} : memref<1x8x32xf32, #tpu.memory_space<vmem>>, vector<1x8x32xf32>,
    return
  }
  func.func @transform_0(%arg0: i32, %arg1: i32) -> (i32, i32, i32) {
    %c0_i32 = arith.constant 0 : i32
    %c0_i32_0 = arith.constant 0 : i32
    return %arg0, %arg1, %c0_i32 : i32, i32, i32
  }
  func.func @transform_1(%arg0: i32, %arg1: i32) -> (i32, i32, i32) {
    %c0_i32 = arith.constant 0 : i32
    %c0_i32_0 = arith.constant 0 : i32
    %c0_i32_1 = arith.constant 0 : i32
    return %arg0, %c0_i32, %c0_i32_0 : i32, i32, i32
  }
  func.func @transform_2(%arg0: i32, %arg1: i32) -> (i32, i32, i32, i32) {
    %c0_i32 = arith.constant 0 : i32
    %c0_i32_0 = arith.constant 0 : i32
    %c0_i32_1 = arith.constant 0 : i32
    %c0_i32_2 = arith.constant 0 : i32
    return %arg0, %c0_i32, %c0_i32_0, %c0_i32_1 : i32, i32, i32, i32
  }
  func.func @transform_3(%arg0: i32, %arg1: i32) -> (i32, i32) {
    %c0_i32 = arith.constant 0 : i32
    %c0_i32_0 = arith.constant 0 : i32
    %c0_i32_1 = arith.constant 0 : i32
    return %c0_i32, %c0_i32_0 : i32, i32
  }
  func.func @transform_4(%arg0: i32, %arg1: i32) -> (i32, i32) {
    %c0_i32 = arith.constant 0 : i32
    %c0_i32_0 = arith.constant 0 : i32
    %c0_i32_1 = arith.constant 0 : i32
    return %c0_i32, %c0_i32_0 : i32, i32
  }
  func.func @transform_5(%arg0: i32, %arg1: i32) -> (i32, i32) {
    %c0_i32 = arith.constant 0 : i32
    %c0_i32_0 = arith.constant 0 : i32
    %c0_i32_1 = arith.constant 0 : i32
    return %c0_i32, %c0_i32_0 : i32, i32
  }
  func.func @transform_6(%arg0: i32, %arg1: i32) -> (i32, i32) {
    %c0_i32 = arith.constant 0 : i32
    %c0_i32_0 = arith.constant 0 : i32
    %c0_i32_1 = arith.constant 0 : i32
    return %c0_i32, %c0_i32_0 : i32, i32
  }
  func.func @transform_7(%arg0: i32, %arg1: i32) -> (i32, i32) {
    %c0_i32 = arith.constant 0 : i32
    %c0_i32_0 = arith.constant 0 : i32
    %c0_i32_1 = arith.constant 0 : i32
    return %c0_i32, %c0_i32_0 : i32, i32
  }
  func.func @transform_8(%arg0: i32, %arg1: i32) -> (i32, i32) {
    %c0_i32 = arith.constant 0 : i32
    %c0_i32_0 = arith.constant 0 : i32
    %c0_i32_1 = arith.constant 0 : i32
    return %c0_i32, %c0_i32_0 : i32, i32
  }
  func.func @transform_9(%arg0: i32, %arg1: i32) -> (i32, i32, i32) {
    %c0_i32 = arith.constant 0 : i32
    %c0_i32_0 = arith.constant 0 : i32
    return %arg0, %arg1, %c0_i32 : i32, i32, i32
  }
  func.func @transform_10(%arg0: i32, %arg1: i32) -> (i32, i32, i32, i32) {
    %c0_i32 = arith.constant 0 : i32
    %c0_i32_0 = arith.constant 0 : i32
    %c0_i32_1 = arith.constant 0 : i32
    return %arg0, %c0_i32, %arg1, %c0_i32_0 : i32, i32, i32, i32
  }
}

</mosaic_0001>

<bundles_post_ra>
// kernel: tpu_custom_call.1
= control target key start
LH: loop header
LB: loop body
LE: loop exit
PB: predicated region body
PF: predicated region fallthrough
CT: control target
= control target key end

     0   :  { %s2647_s0 = inlined_call_operand.hbm [shape: f32[2,8,32], index: 0, kind: input, shape index: {}]   ;;  %s2648_s1 = inlined_call_operand.hbm [shape: f32[2,8,32], index: 1, kind: input, shape index: {}]   ;;  %s2649_s2 = inlined_call_operand.vmem [shape: f32[2,1,1,8], index: 2, kind: input, shape index: {}]   ;;  %s2650_s3 = inlined_call_operand.hbm [shape: f32[32,32], index: 3, kind: input, shape index: {}]   ;;  %s2651_s4 = inlined_call_operand.vmem [shape: f32[1,32], index: 4, kind: input, shape index: {}]   ;;  %s2652_s5 = inlined_call_operand.hbm [shape: f32[32,64], index: 5, kind: input, shape index: {}]   ;;  %s2653_s6 = inlined_call_operand.vmem [shape: f32[1,64], index: 6, kind: input, shape index: {}]   ;;  %s2654_s7 = inlined_call_operand.hbm [shape: f32[32,32], index: 7, kind: input, shape index: {}]   ;;  %s2655_s8 = inlined_call_operand.vmem [shape: f32[1,32], index: 8, kind: input, shape index: {}]   ;;  %s2656_s9 = inlined_call_operand.hbm [shape: f32[2,8,32], index: 9, kind: output, shape index: {0}]   ;;  %s2657_s10 = inlined_call_operand.hbm [shape: f32[2,4,8,8], index: 10, kind: output, shape index: {1}]  }
   0x1   :  { %2664 = sst [smem:[#allocation23_spill]] %s2647_s0 }
   0x2   :  { %2665 = sst [smem:[#allocation24_spill]] %s2650_s3 }
   0x3   :  { %2666 = sst [smem:[#allocation25_spill]] %s2652_s5 }
   0x4   :  { %2667 = sst [smem:[#allocation26_spill]] %s2654_s7 }
   0x5   :  { %2668 = sst [smem:[#allocation27_spill]] %s2656_s9 }
   0x6   :  { %16 = vsyncpa [#allocation3], 0 }
   0x7   :  { %18 = vsyncpa [#allocation3 + $0x1], 0 }
   0x8   :  { %19 = vsyncpa [#allocation6], 0 }
   0x9   :  { %21 = vsyncpa [#allocation6 + $0x1], 0 }
   0xa   :  { %22 = vsyncpa [#allocation9], 0 }
   0xb   :  { %23 = vsyncpa [#allocation4], 0 }
   0xc   :  { %25 = vsyncpa [#allocation4 + $0x1], 0 }
   0xd   :  { %26 = vsyncpa [#allocation13], 0 }
   0xe   :  { %28 = vsyncpa [#allocation13 + $0x1], 0  ;;  %s2294_s13 = smov 0   ;;  %s2296_s14 = smov 0  }
   0xf   :  { %s2298_s15 = smov 0   ;;  %s2300_s16 = smov 0  }
  0x10   :  { %s2302_s17 = smov 0   ;;  %s2304_s18 = smov 0  }
  0x11 LB: > { %2669 = sst [smem:[#allocation20_spill]] %s2194_s13  ;;  %s2325_s19 = sadd.s32 4294967295, %s2214_s18   ;;  %s2214_s18 = sphi %s2304_s18, %s34_s18   ;;  %s2210_s17 = sphi %s2302_s17, %s2698_s17   ;;  %s2206_s16 = sphi %s2300_s16, %s2697_s16   ;;  %s2202_s15 = sphi %s2298_s15, %s2696_s15   ;;  %s2198_s14 = sphi %s2296_s14, %s2695_s14   ;;  %s2194_s13 = sphi %s2294_s13, %s2694_s13  }
  0x12   : > { %s1671_s20 = sadd.s32 4294967294, %s2214_s18   ;;  %p68_p0 = scmp.ne.s32.totalorder %s2198_s14, %s2194_s13 }
  0x13   : > { %p2658_p1 = scmp.eq.s32.totalorder %s2325_s19, 0  ;;  %p278_p3 = scmp.eq.s32.totalorder %s1671_s20, 1 }
  0x14   : > { %p1672_p5 = scmp.ge.s32.totalorder %s2214_s18, 1  ;;  %p313_p7 = scmp.lt.s32.totalorder %s2214_s18, 3 }
  0x15   : > { %p2334_p4 = por %p2658_p1, %p68_p0  ;;  %p2339_p6 = por %p278_p3, %p68_p0 }
  0x16   : > { %p2344_p8 = pnand %p1672_p5, %p313_p7  ;;  %s2216_s24 = smov [#allocation7]  }
  0x17   : > { %s2670_s21 = scalar_select %p2334_p4, 1, 0 }
  0x18   : > { %s2671_s22 = scalar_select %p2339_p6, 1, 0 }
  0x19   : > { %s325_s25 = sshll.u32 %s2216_s24, 4  ;;  %p1843_p9 = pneg %p2344_p8  ;;  %s326_s25 = int_to_ptr.vmem [resolvable:$true] %s325_s25 }
  0x1a   : > { %2672 = sst [smem:[#allocation21_spill]] %s2671_s22  ;;  %s2217_s27 = smov [#allocation8]  }
  0x1b   : > { %p2353_p11 = pnand %p1843_p9, %p2658_p1  ;;  %s341_s28 = sshll.u32 %s2217_s27, 4  ;;  %s342_s28 = int_to_ptr.vmem [resolvable:$true] %s341_s28 }
  0x1c   : > { %s2218_s29 = smov [#allocation10]   ;;  %s1969_s11 = scalar_lea.vmem %s326_s25, 512 }
  0x1d   : > { %s357_s30 = sshll.u32 %s2218_s29, 4  ;;  %p1960_p12 = pneg %p2353_p11  ;;  %s358_s30 = int_to_ptr.vmem [resolvable:$true] %s357_s30 }
  0x1e   : > { %p1970_p13 = scmp.ne.s32.totalorder %s326_s25, %s1969_s11  ;;  %p1977_p5 = scmp.lt.s32.totalorder %s326_s25, %s326_s25 }
  0x1f   : > { %p1978_p7 = scmp.lt.s32.totalorder %s1969_s11, %s1969_s11 }
  0x20   : > { %p1972_p0 = pnand %p1970_p13, %p1960_p12 }
  0x21   : > { %p1979_p9 = por %p1978_p7, %p1977_p5 }
  0x22   : > { %p1973_p3 = pneg %p1972_p0 }
  0x24   : > { %p1980_p10 = pnand %p1979_p9, %p1973_p3 }
  0x26   : > { %1983 = shalt.err (!%p1980_p10)
}
  0x27   : > { %s2219_s12 = smov 128   ;;  %s2220_s20 = smov 8  }
  0x28   : > { %s2675_s3 = sld [smem:[#allocation24_spill]]  ;;  %s1995_s29 = scalar_lea.vmem %s342_s28, 512 }
  0x29   : > { %p1996_p1 = scmp.ne.s32.totalorder %s342_s28, %s1995_s29  ;;  %p2003_p2 = scmp.lt.s32.totalorder %s342_s28, %s342_s28 }
  0x2a   : > { %p2004_p6 = scmp.lt.s32.totalorder %s1995_s29, %s1995_s29 }
  0x2b   : > { %p1998_p13 = pnand %p1996_p1, %p1960_p12 }
  0x2c   : > { %p2005_p5 = por %p2004_p6, %p2003_p2 }
  0x2d   : > { %p1999_p0 = pneg %p1998_p13 }
  0x2e   : > { %1846 = dma.hbm_to_vmem [thread:$0]  (!%p2353_p11), %s2675_s3, 512, %s326_s25, [#allocation6], %s2219_s12, %s2219_s12, %s2220_s20  }
  0x2f   : > { %p2006_p3 = pnand %p2005_p5, %p1999_p0 }
  0x31   : > { %2009 = shalt.err (!%p2006_p3)
}
  0x32   : > { %s2676_s5 = sld [smem:[#allocation25_spill]]  ;;  %s2021_s25 = scalar_lea.vmem %s358_s30, 512 }
  0x33   : > { %p2022_p10 = scmp.ne.s32.totalorder %s358_s30, %s2021_s25  ;;  %p2029_p9 = scmp.lt.s32.totalorder %s358_s30, %s358_s30 }
  0x34   : > { %p2030_p13 = scmp.lt.s32.totalorder %s2021_s25, %s2021_s25 }
  0x35   : > { %p2024_p7 = pnand %p2022_p10, %p1960_p12 }
  0x36   : > { %p2031_p4 = por %p2030_p13, %p2029_p9 }
  0x37   : > { %p2025_p1 = pneg %p2024_p7 }
  0x38   : > { %1849 = dma.hbm_to_vmem [thread:$0]  (!%p2353_p11), %s2676_s5, 512, %s342_s28, [#allocation9], %s2219_s12, %s2219_s12, %s2220_s20  }
  0x39   : > { %p2032_p2 = pnand %p2031_p4, %p2025_p1 }
  0x3b   : > { %2035 = shalt.err (!%p2032_p2)
}
  0x3c   : > { %s2677_s7 = sld [smem:[#allocation26_spill]]  ;;  %s55_s22 = sadd.s32 1, %s2202_s15 }
  0x3d   : > { %s46_s28 = sadd.s32 1, %s2210_s17  ;;  %p62_p4 = scmp.ne.s32.totalorder %s2202_s15, %s2198_s14 }
  0x3e   : > { %p48_p6 = scmp.ge.s32.totalorder %s46_s28, 2  ;;  %p63_p12 = scmp.eq.s32.totalorder %s2214_s18, 0 }
  0x3f   : > { %p2678_p0 = scmp.eq.s32.totalorder %s2325_s19, 1  ;;  %p1870_p3 = scmp.lt.s32.totalorder %s2214_s18, 2 }
  0x40   : > { %s2700_s28 = smov (%p48_p6, %s46_s28), 0  ;;  %p64_p10 = por %p63_p12, %p62_p4 }
  0x41   : > { %p2390_p5 = por %p2678_p0, %p62_p4  ;;  %2680 = sst [smem:[#allocation22_spill]] %s2700_s28 }
  0x42   : > { %1852 = dma.hbm_to_vmem [thread:$0]  (!%p2353_p11), %s2677_s7, 512, %s358_s30, [#allocation9], %s2219_s12, %s2219_s12, %s2220_s20  }
  0x43   : > { %s374_s29 = sand.u32 1, %s2202_s15   ;;  %s50_s11 = ssub.s32 %s2210_s17, %s2700_s28 }
  0x44   : > { %p53_p11 = scmp.eq.s32.totalorder %s50_s11, 0  ;;  %s1677_s30 = sshll.u32 %s374_s29, 3 }
  0x45   : > { %s1678_s12 = sshll.u32 %s2210_s17, 7  ;;  %s2681_s0 = sld [smem:[#allocation23_spill]] }
  0x46   : > { %s2402_s20 = scalar_select %p53_p11, %s2202_s15, %s55_s22  }
  0x47   : > { %s378_s3 = scalar_lea.vmem [#allocation2], %s1677_s30  ;;  %p2409_p7 = pnand %p1870_p3, %p64_p10 }
  0x48   : > { %s386_s5 = sshll.u32 %s378_s3, 4  ;;  %s2416_s11 = scalar_lea.hbm %s2648_s1, %s1678_s12  ;;  %s387_s5 = int_to_ptr.vmem [resolvable:$true] %s386_s5 }
  0x49   : > { %s393_s22 = sand.u32 1, %s2214_s18   ;;  %s375_s28 = scalar_lea.sflag [#allocation3], %s374_s29 }
  0x4a   : > { %p2038_p1 = pneg %p2409_p7  ;;  %s2049_s25 = scalar_lea.vmem %s387_s5, 128 }
  0x4b   : > { %s384_s27 = scalar_lea.hbm %s2681_s0, %s1678_s12  ;;  %p2050_p9 = scmp.ne.s32.totalorder %s387_s5, %s2049_s25 }
  0x4c   : > { %s2221_s3 = smov [#allocation2]  }
  0x4d   : > { %p2052_p13 = pnand %p2050_p9, %p2038_p1  ;;  %s2054_s24 = sshll.u32 %s2221_s3, 4  ;;  %s2055_s24 = int_to_ptr.vmem [resolvable:$false] %s2054_s24 }
  0x4e   : > { %s2056_s0 = scalar_lea.vmem %s2055_s24, 256  ;;  %p2057_p4 = scmp.lt.s32.totalorder %s387_s5, %s2055_s24 }
  0x4f   : > { %p2053_p2 = pneg %p2052_p13  ;;  %p2058_p6 = scmp.lt.s32.totalorder %s2056_s0, %s2049_s25 }
  0x51   : > { %p2059_p12 = por %p2058_p6, %p2057_p4 }
  0x53   : > { %p2060_p0 = pnand %p2059_p12, %p2053_p2 }
  0x55   : > { %2063 = shalt.err (!%p2060_p0)
}
  0x56   : > { %1856 = dma.hbm_to_vmem [thread:$0]  (!%p2409_p7), %s384_s27, 128, %s387_s5, %s375_s28  }
  0x57   : > { %s397_s9 = scalar_lea.vmem [#allocation5], %s1677_s30  ;;  %s394_s29 = scalar_lea.sflag [#allocation6], %s393_s22 }
  0x58   : > { %s404_s13 = sshll.u32 %s397_s9, 4  ;;  %s2222_s3 = smov [#allocation5]   ;;  %s405_s13 = int_to_ptr.vmem [resolvable:$true] %s404_s13 }
  0x59   : > { %s2077_s12 = scalar_lea.vmem %s405_s13, 128  ;;  %s2082_s24 = sshll.u32 %s2222_s3, 4  ;;  %s2083_s24 = int_to_ptr.vmem [resolvable:$false] %s2082_s24 }
  0x5a   : > { %p2078_p3 = scmp.ne.s32.totalorder %s405_s13, %s2077_s12  ;;  %s2084_s0 = scalar_lea.vmem %s2083_s24, 256 }
  0x5b   : > { %p2085_p9 = scmp.lt.s32.totalorder %s405_s13, %s2083_s24  ;;  %p2086_p13 = scmp.lt.s32.totalorder %s2084_s0, %s2077_s12 }
  0x5c   : > { %p2080_p10 = pnand %p2078_p3, %p2038_p1 }
  0x5d   : > { %p2087_p2 = por %p2086_p13, %p2085_p9 }
  0x5e   : > { %p2081_p11 = pneg %p2080_p10 }
  0x60   : > { %p2088_p4 = pnand %p2087_p2, %p2081_p11 }
  0x62   : > { %2091 = shalt.err (!%p2088_p4)
}
  0x63   : > { %1859 = dma.hbm_to_vmem [thread:$0]  (!%p2409_p7), %s2416_s11, 128, %s405_s13, %s394_s29  }
  0x64   : > { %419 = sbr.rel (%p2344_p8) target bundleno = 1475 (0x5c3), region = 56  ;;  %s2435_s5 = sand.u32 (!%p2344_p8), 1, %s2198_s14  }
  0x65   : > { %s2438_s28 = sshll.u32 (!%p2344_p8), %s2435_s5, 3  ;;  %s422_s30 = scalar_lea.sflag (!%p2344_p8), [#allocation3], %s2435_s5 }
  0x66   : > { %s425_s27 = scalar_lea.vmem (!%p2344_p8), [#allocation2], %s2438_s28  ;;  %p2683_p1 = scmp.ne.s32.totalorder (!%p2344_p8), %s2670_s21, 0 }
  0x69   : > { %2169 = dma.done.wait (%p2683_p1), %s422_s30, 128  }
  0x6a   : > { %2171 = vsyncadd (%p2683_p1), %s422_s30, 4294967168  ;;  %s430_s7 = sand.u32 1, %s2325_s19   ;;  %s434_s11 = scalar_lea.vmem [#allocation5], %s2438_s28 }
  0x6b   : > { %s431_s23 = scalar_lea.sflag [#allocation6], %s430_s7 }
  0x6c   : > { %2173 = dma.done.wait (%p2683_p1), %s431_s23, 128  }
  0x6d   : > { %2175 = vsyncadd (%p2683_p1), %s431_s23, 4294967168  ;;  %p2684_p8 = scmp.eq.s32.totalorder %s2325_s19, 0 }
  0x6f   : > { %2177 = dma.done.wait (%p2684_p8), [#allocation6], 512   ;;  %p2685_p7 = pmov %p2684_p8 }
  0x71   : > { %2179 = vsyncadd (%p2685_p7), [#allocation6], 4294966784  ;;  %p2686_p6 = pmov %p2685_p7 }
  0x73   : > { %2181 = dma.done.wait (%p2686_p6), [#allocation9], 1024   ;;  %p2687_p12 = pmov %p2686_p6 }
  0x74   : > { %v2223_v0 = vmov 0.0   ;;  %vm2224_vm0 = vmmov 0   ;;  %v589_v1 = vld [vmem:[#allocation8 + $0x18] sm:$0xff]  ;;  %v588_v3 = vld [vmem:[#allocation8 + $0x10] sm:$0xff]  ;;  %v587_v5 = vld [vmem:[#allocation8 + $0x8] sm:$0xff]  ;;  %vm512_vm1 = vcmask 261120   ;;  %v672_v25 = vlaneseq }
  0x75   : > { %2183 = vsyncadd (%p2687_p12), [#allocation9], 4294966272  ;;  %1761 = vmatprep.subr.mxu1 %v2223_v0  ;;  %1750 = vmatprep.subr.mxu0 %v2223_v0  ;;  %v504_v2 = vld [vmem:[#allocation7 + $0x18] sm:$0xff]  ;;  %v503_v4 = vld [vmem:[#allocation7 + $0x10] sm:$0xff]  ;;  %vm687_vm2 = vcmask 64512   ;;  %s2225_s9 = smov 112  }
  0x76   : > { %1769 = vmatprep.mubr.msk.f32.mxu1 %vm2224_vm0, %v2223_v0  ;;  %1758 = vmatprep.mubr.msk.f32.mxu0 %vm2224_vm0, %v2223_v0  ;;  %v502_v6 = vld [vmem:[#allocation7 + $0x8] sm:$0xff]  ;;  %v586_v7 = vld [vmem:[#allocation8] sm:$0xff]  ;;  %v500_v9 = vld [vmem:[%s434_s11] sm:$0xff]  ;;  %s2226_s13 = smov 120   ;;  %s2227_s29 = smov 104   ;;  %v673_v26 = vshrl.u32 %v672_v25, 7 }
  0x77   : > { %1762 = vmatpush3.msra.mxu1 %v589_v1  ;;  %1751 = vmatpush3.msra.mxu0 %v504_v2  ;;  %v501_v8 = vld [vmem:[#allocation7] sm:$0xff]  ;;  %p496_p0 = scmp.lt.s32.totalorder %s2206_s16, 1  ;;  %v677_v27 = vand.u32 127, %v672_v25  ;;  %v2228_v29 = vmov -3.4028235e+38   ;;  %s2229_s30 = smov 96  }
  0x78   : > { %1763 = vmatprep.subr.mxu1 %v2223_v0  ;;  %1752 = vmatprep.subr.mxu0 %v2223_v0  ;;  %v499_v10 = vld [vmem:[%s425_s27] sm:$0xff]  ;;  %s2230_s27 = smov 80   ;;  %s2231_s7 = smov 72   ;;  %vm1370_vm4 = vcmask 130048   ;;  %vm1372_vm5 = vcmask 195584  }
  0x79   : > { %1764 = vmatpush3.msra.mxu1 %v588_v3  ;;  %1753 = vmatpush3.msra.mxu0 %v503_v4  ;;  %v1691_v11 = vld [vmem:[%s2653_s6] ss:$0 sm:$0xff]  ;;  %s497_s12 = scalar_select %p496_p0, %s2206_s16, 1  ;;  %vm678_vm3 = vcmp.le.s32.totalorder %v677_v27, %v673_v26  ;;  %v1377_v27 = vld [vmem:[#allocation10 + $0x18] sm:$0xff] }
  0x7a   : > { %1765 = vmatprep.subr.mxu1 %v2223_v0  ;;  %1754 = vmatprep.subr.mxu0 %v2223_v0  ;;  %v1689_v13 = vld [vmem:[%s2651_s4] ss:$0 sm:$0xff]  ;;  %v679_v30 = vsel %vm678_vm3, 0.0, %v2228_v29  ;;  %s2232_s23 = smov 88   ;;  %s1688_s11 = sshll.u32 %s2435_s5, 5  ;;  %v1375_v29 = vld [vmem:[#allocation10 + $0x8] sm:$0xff] }
  0x7b   : > { %1766 = vmatpush3.msra.mxu1 %v587_v5  ;;  %1755 = vmatpush3.msra.mxu0 %v502_v6  ;;  %s498_s0 = scalar_lea.vmem %s2649_s2, %s497_s12  ;;  %s2535_s19 = scalar_lea.vmem [#allocation12], %s1688_s11 }
  0x7c   : > { %1767 = vmatprep.subr.mxu1 %v2223_v0  ;;  %1756 = vmatprep.subr.mxu0 %v2223_v0  ;;  %v1693_v28 = vld [vmem:[%s498_s0] ss:$0 sm:$0xff]  ;;  %s2233_s21 = smov 8   ;;  %s2234_s22 = smov 16  }
  0x7d   : > { %1768 = vmatpush3.msra.mxu1 %v586_v7  ;;  %1757 = vmatpush3.msra.mxu0 %v501_v8  ;;  %v686_v31 = vadd.f32 %v1693_v28, %v679_v30  ;;  %v1376_v28 = vld [vmem:[#allocation10 + $0x10] sm:$0xff]  ;;  %v1374_v30 = vld [vmem:[#allocation10] sm:$0xff]  ;;  %s2235_s25 = smov 24   ;;  %s1465_s24 = scalar_lea.sflag [#allocation13], %s2435_s5 }
  0x7e   : > { %1770 = vmatmul.mubr.msk.f32.vlgmr.msra.gmra.mxu1 %vm512_vm1, %v500_v9  ;;  %1759 = vmatmul.mubr.msk.f32.vlgmr.msra.gmra.mxu0 %vm512_vm1, %v499_v10 }
  0x7f   : > { %1772 = vmatprep.subr.mxu1 %v2223_v0  ;;  %1774 = vmatprep.mubr.msk.f32.mxu1 %vm2224_vm0, %v2223_v0 }
  0x80   : > { %1782 = vmatprep.subr.mxu0 %v2223_v0  ;;  %1784 = vmatprep.mubr.msk.f32.mxu0 %vm2224_vm0, %v2223_v0 }
 0x13e   : > { %v666_v12 = vpop.f32.mrf.mxu1  ;;  %v582_v14 = vpop.f32.mrf.mxu0 }
 0x13f   : > { %v2490_v15 = vadd.f32 %v1691_v11, %v666_v12  ;;  %v583_v18 = vadd.f32 %v1689_v13, %v582_v14 }
 0x140   : > { %v1771_v16 = vpop.f32.mrf.mxu1  ;;  %v1760_v17 = vpop.f32.mrf.mxu0 }
 0x141   : > { %1023 = vrot.lane.b32.xlu1 %v2490_v15, %s2225_s9  ;;  %855 = vrot.lane.b32.xlu0 %v2490_v15, %s2226_s13 }
 0x142   : > { %1773 = vmatpush3.xpose.msk.msra.mxu1 %vm687_vm2, %v2490_v15 }
 0x143   : > { %1777 = vmatprep.subr.mxu1 %v2223_v0 }
 0x145   : > { %1775 = vmatmul.mubr.msk.f32.vlgmr.msra.gmra.mxu1 %vm687_vm2, %v583_v18  ;;  %1021 = vrot.lane.b32.xlu1 %v583_v18, %s2225_s9  ;;  %s1718_s9 = sshll.u32 %s2206_s16, 9 }
 0x146   : > { %853 = vrot.lane.b32.xlu0 %v583_v18, %s2226_s13  ;;  %1779 = vmatprep.mubr.msk.f32.mxu1 %vm2224_vm0, %v2223_v0  ;;  %s1493_s13 = sshll.u32 %s2535_s19, 4  ;;  %s2568_s3 = scalar_lea.hbm %s2657_s10, %s1718_s9  ;;  %s2570_s13 = int_to_ptr.vmem [resolvable:$true] %s1493_s13 }
 0x147   : > { %s2092_s0 = scalar_lea.vmem %s2570_s13, 512 }
 0x148   : > { %p2093_p3 = scmp.ne.s32.totalorder %s2570_s13, %s2092_s0 }
 0x149   : > { %1189 = vrot.lane.b32.xlu1 %v583_v18, %s2227_s29 }
 0x14a   : > { %1191 = vrot.lane.b32.xlu0 %v2490_v15, %s2227_s29  ;;  %p2094_p10 = pnand %p2093_p3, %p2390_p5 }
 0x14c   : > { %p2095_p11 = pneg %p2094_p10 }
 0x1b3   : > { %v856_v19 = vpop.permute.xlu0 %855  ;;  %v1024_v20 = vpop.permute.xlu1 %1023 }
 0x1b4   : > { %1783 = vmatpush3.xpose.msk.msra.mxu0 %vm687_vm2, %v856_v19 }
 0x1b5   : > { %1792 = vmatprep.subr.mxu0 %v2223_v0 }
 0x1b7   : > { %v1022_v22 = vpop.permute.xlu1 %1021 }
 0x1b8   : > { %v854_v21 = vpop.permute.xlu0 %853 }
 0x1b9   : > { %1785 = vmatmul.mubr.msk.f32.vlgmr.msra.gmra.mxu0 %vm687_vm2, %v854_v21 }
 0x1ba   : > { %1793 = vmatpush3.xpose.msk.msra.mxu0 %vm687_vm2, %v1024_v20  ;;  %1794 = vmatprep.mubr.msk.f32.mxu0 %vm2224_vm0, %v2223_v0 }
 0x1bb   : > { %1802 = vmatprep.subr.mxu0 %v2223_v0  ;;  %v1190_v24 = vpop.permute.xlu1 %1189 }
 0x1bc   : > { %v1192_v23 = vpop.permute.xlu0 %1191 }
 0x1bd   : > { %1795 = vmatmul.mubr.msk.f32.vlgmr.msra.gmra.mxu0 %vm687_vm2, %v1022_v22 }
 0x1be   : > { %1803 = vmatpush3.xpose.msk.msra.mxu0 %vm687_vm2, %v1192_v23  ;;  %1804 = vmatprep.mubr.msk.f32.mxu0 %vm2224_vm0, %v2223_v0 }
 0x1bf   : > { %1812 = vmatprep.subr.mxu0 %v2223_v0 }
 0x1c1   : > { %1805 = vmatmul.mubr.msk.f32.vlgmr.msra.gmra.mxu0 %vm687_vm2, %v1190_v24 }
 0x1c2   : > { %1820 = vmatprep.mubr.msk.f32.mxu0 %vm2224_vm0, %v2223_v0  ;;  %1813 = vmatpush3.msra.mxu0 %v1377_v27 }
 0x1c3   : > { %1814 = vmatprep.subr.mxu0 %v2223_v0 }
 0x1c4   : > { %1815 = vmatpush3.msra.mxu0 %v1376_v28 }
 0x1c5   : > { %1816 = vmatprep.subr.mxu0 %v2223_v0 }
 0x1c6   : > { %1817 = vmatpush3.msra.mxu0 %v1375_v29 }
 0x1c7   : > { %1818 = vmatprep.subr.mxu0 %v2223_v0 }
 0x1c8   : > { %1819 = vmatpush3.msra.mxu0 %v1374_v30 }
 0x205   : > { %v760_v32 = vpop.f32.mrf.mxu1 }
 0x206   : > { %v761_v33 = vadd.f32 %v760_v32, %v686_v31 }
 0x207   : > { %v1776_v34 = vpop.f32.mrf.mxu1 }
 0x208   : > { %v764_v35 = vmax.f32 %v761_v33, -3.4028235e+38 }
 0x20a   : > { %v765_v36 = vsel %vm687_vm2, %v764_v35, -inf }
 0x20b   : > { %766 = vmax.xlane.f32.xlu0 %v765_v36 }
 0x279   : > { %v927_v37 = vpop.f32.mrf.mxu0 }
 0x27a   : > { %v928_v38 = vadd.f32 %v927_v37, %v686_v31 }
 0x27b   : > { %v1786_v39 = vpop.f32.mrf.mxu0 }
 0x27c   : > { %v931_v40 = vmax.f32 %v928_v38, -3.4028235e+38 }
 0x27d   : > { %v1095_v41 = vpop.f32.mrf.mxu0 }
 0x27e   : > { %v1096_v42 = vadd.f32 %v1095_v41, %v686_v31  ;;  %v932_v43 = vsel %vm687_vm2, %v931_v40, -inf }
 0x27f   : > { %933 = vmax.xlane.f32.xlu1 %v932_v43  ;;  %v1796_v44 = vpop.f32.mrf.mxu0 }
 0x280   : > { %v1099_v45 = vmax.f32 %v1096_v42, -3.4028235e+38 }
 0x281   : > { %v1263_v46 = vpop.f32.mrf.mxu0 }
 0x282   : > { %v1264_v47 = vadd.f32 %v1263_v46, %v686_v31  ;;  %v1100_v48 = vsel %vm687_vm2, %v1099_v45, -inf }
 0x283   : > { %1101 = vmax.xlane.f32.xlu0 %v1100_v48  ;;  %v1806_v49 = vpop.f32.mrf.mxu0 }
 0x284   : > { %v1267_v50 = vmax.f32 %v1264_v47, -3.4028235e+38 }
 0x286   : > { %v1268_v51 = vsel %vm687_vm2, %v1267_v50, -inf }
 0x287   : > { %1269 = vmax.xlane.f32.xlu0 %v1268_v51 }
 0x290   : > { %777 = vrot.lane.b32.xlu1 %v2490_v15, %s2229_s30  ;;  %s2236_s30 = smov [#allocation12]  }
 0x294   : > { %v767_v52 = vpop.xlane.xlu0 %766 }
 0x295   : > { %v768_v53 = vsub.f32 %v764_v35, %v767_v52 }
 0x297   : > { %v769_v54 = vmul.f32 1.442695, %v768_v53 }
 0x299   : > { %1942 = vpow2.f32 %v769_v54 }
 0x2a6   : > { %v1943_v55 = vpop.eup %1942 }
 0x2a7   : > { %v771_v56 = vsel %vm687_vm2, %v1943_v55, 0.0 }
 0x2b4   : > { %772 = vadd.xlane.f32.xlu1 %v771_v56 }
 0x308   : > { %v934_v57 = vpop.xlane.xlu1 %933 }
 0x309   : > { %v935_v58 = vsub.f32 %v931_v40, %v934_v57 }
 0x30b   : > { %v936_v59 = vmul.f32 1.442695, %v935_v58 }
 0x30c   : > { %v778_v60 = vpop.permute.xlu1 %777  ;;  %v1102_v61 = vpop.xlane.xlu0 %1101 }
 0x30d   : > { %1944 = vpow2.f32 %v936_v59  ;;  %v1103_v62 = vsub.f32 %v1099_v45, %v1102_v61  ;;  %1778 = vmatpush3.msra.mxu1 %v778_v60 }
 0x30e   : > { %1787 = vmatprep.subr.mxu1 %v2223_v0 }
 0x30f   : > { %v1104_v63 = vmul.f32 1.442695, %v1103_v62 }
 0x310   : > { %v1270_v1 = vpop.xlane.xlu0 %1269 }
 0x311   : > { %1946 = vpow2.f32 %v1104_v63  ;;  %v1271_v2 = vsub.f32 %v1267_v50, %v1270_v1 }
 0x313   : > { %v1272_v3 = vmul.f32 1.442695, %v1271_v2 }
 0x315   : > { %1948 = vpow2.f32 %v1272_v3 }
 0x31a   : > { %v1945_v4 = vpop.eup %1944 }
 0x31b   : > { %v938_v5 = vsel %vm687_vm2, %v1945_v4, 0.0 }
 0x31c   : > { %939 = vadd.xlane.f32.xlu0 %v938_v5 }
 0x31e   : > { %v1947_v6 = vpop.eup %1946 }
 0x31f   : > { %v1106_v7 = vsel %vm687_vm2, %v1947_v6, 0.0 }
 0x320   : > { %1107 = vadd.xlane.f32.xlu1 %v1106_v7 }
 0x322   : > { %v1949_v8 = vpop.eup %1948 }
 0x323   : > { %v1274_v9 = vsel %vm687_vm2, %v1949_v8, 0.0 }
 0x324   : > { %1275 = vadd.xlane.f32.xlu0 %v1274_v9 }
 0x331   : > { %1113 = vrot.lane.b32.xlu1 %v2490_v15, %s2230_s27  ;;  %s2096_s27 = sshll.u32 %s2236_s30, 4  ;;  %s2097_s27 = int_to_ptr.vmem [resolvable:$false] %s2096_s27 }
 0x332   : > { %p2099_p9 = scmp.lt.s32.totalorder %s2570_s13, %s2097_s27 }
 0x335   : > { %1281 = vrot.lane.b32.xlu1 %v2490_v15, %s2231_s7  ;;  %s2098_s7 = scalar_lea.vmem %s2097_s27, 1024 }
 0x336   : > { %p2100_p13 = scmp.lt.s32.totalorder %s2098_s7, %s2092_s0 }
 0x338   : > { %p2101_p2 = por %p2100_p13, %p2099_p9 }
 0x33a   : > { %945 = vrot.lane.b32.xlu0 %v2490_v15, %s2232_s23  ;;  %p2102_p4 = pnand %p2101_p2, %p2095_p11 }
 0x33d   : > { %v773_v10 = vpop.xlane.xlu1 %772 }
 0x33e   : > { %1950 = vrcp.f32 %v773_v10 }
 0x34b   : > { %v1951_v11 = vpop.eup %1950 }
 0x34c   : > { %v775_v12 = vmul.f32 %v1951_v11, %v1943_v55 }
 0x34e   : > { %776 = vst.msk [vmem:[%s2535_s19] sm:$0xff] %vm687_vm2, %v775_v12  ;;  %1780 = vmatmul.mubr.msk.f32.vlgmr.msra.gmra.mxu1 %vm687_vm2, %v775_v12 }
 0x34f   : > { %1789 = vmatprep.mubr.msk.f32.mxu1 %vm2224_vm0, %v2223_v0 }
 0x3a5   : > { %v940_v13 = vpop.xlane.xlu0 %939 }
 0x3a6   : > { %1952 = vrcp.f32 %v940_v13 }
 0x3a9   : > { %v1108_v14 = vpop.xlane.xlu1 %1107 }
 0x3aa   : > { %1954 = vrcp.f32 %v1108_v14 }
 0x3ad   : > { %v1276_v15 = vpop.xlane.xlu0 %1275  ;;  %v1114_v18 = vpop.permute.xlu1 %1113 }
 0x3ae   : > { %1956 = vrcp.f32 %v1276_v15 }
 0x3b1   : > { %v946_v16 = vpop.permute.xlu0 %945  ;;  %v1282_v22 = vpop.permute.xlu1 %1281 }
 0x3b2   : > { %1788 = vmatpush3.msra.mxu1 %v946_v16 }
 0x3b3   : > { %v1953_v17 = vpop.eup %1952  ;;  %1797 = vmatprep.subr.mxu1 %v2223_v0 }
 0x3b4   : > { %v942_v19 = vmul.f32 %v1953_v17, %v1945_v4 }
 0x3b6   : > { %1699 = vst.msk [vmem:[%s2535_s19 + $0x8] sm:$0xff] %vm687_vm2, %v942_v19  ;;  %1790 = vmatmul.mubr.msk.f32.vlgmr.msra.gmra.mxu1 %vm687_vm2, %v942_v19 }
 0x3b7   : > { %v1955_v20 = vpop.eup %1954  ;;  %1798 = vmatpush3.msra.mxu1 %v1114_v18  ;;  %1799 = vmatprep.mubr.msk.f32.mxu1 %vm2224_vm0, %v2223_v0 }
 0x3b8   : > { %1807 = vmatprep.subr.mxu1 %v2223_v0  ;;  %v1110_v21 = vmul.f32 %v1955_v20, %v1947_v6 }
 0x3ba   : > { %1703 = vst.msk [vmem:[%s2535_s19 + $0x10] sm:$0xff] %vm687_vm2, %v1110_v21  ;;  %1800 = vmatmul.mubr.msk.f32.vlgmr.msra.gmra.mxu1 %vm687_vm2, %v1110_v21 }
 0x3bb   : > { %v1957_v23 = vpop.eup %1956  ;;  %1808 = vmatpush3.msra.mxu1 %v1282_v22  ;;  %1809 = vmatprep.mubr.msk.f32.mxu1 %vm2224_vm0, %v2223_v0 }
 0x3bc   : > { %v1278_v24 = vmul.f32 %v1957_v23, %v1949_v8 }
 0x3be   : > { %1707 = vst.msk [vmem:[%s2535_s19 + $0x18] sm:$0xff] %vm687_vm2, %v1278_v24  ;;  %1810 = vmatmul.mubr.msk.f32.vlgmr.msra.gmra.mxu1 %vm687_vm2, %v1278_v24 }
 0x40e   : > { %v849_v25 = vpop.f32.mrf.mxu1 }
 0x410   : > { %v1781_v26 = vpop.f32.mrf.mxu1 }
 0x476   : > { %v1017_v31 = vpop.f32.mrf.mxu1 }
 0x477   : > { %1358 = vrot.lane.b32.xlu0 %v1017_v31, %s2233_s21 }
 0x478   : > { %v1791_v32 = vpop.f32.mrf.mxu1 }
 0x47a   : > { %v1185_v33 = vpop.f32.mrf.mxu1 }
 0x47b   : > { %1362 = vrot.lane.b32.xlu1 %v1185_v33, %s2234_s22 }
 0x47c   : > { %v1801_v34 = vpop.f32.mrf.mxu1 }
 0x47e   : > { %v1353_v35 = vpop.f32.mrf.mxu1 }
 0x47f   : > { %1366 = vrot.lane.b32.xlu0 %v1353_v35, %s2235_s25 }
 0x480   : > { %v1811_v36 = vpop.f32.mrf.mxu1 }
 0x4e9   : > { %v1359_v37 = vpop.permute.xlu0 %1358 }
 0x4ea   : > { %v1369_v38 = vsel %vm687_vm2, %v849_v25, %v1359_v37 }
 0x4ed   : > { %v1363_v0 = vpop.permute.xlu1 %1362 }
 0x4ee   : > { %v1371_v39 = vsel %vm1370_vm4, %v1369_v38, %v1363_v0 }
 0x4f1   : > { %v1367_v40 = vpop.permute.xlu0 %1366 }
 0x4f2   : > { %v1373_v41 = vsel %vm1372_vm5, %v1371_v39, %v1367_v40 }
 0x4f3   : > { %1821 = vmatmul.mubr.msk.f32.vlgmr.msra.gmra.mxu0 %vm512_vm1, %v1373_v41 }
 0x4f4   : > { %2105 = shalt.err (!%p2102_p4)
}
 0x4f5   : > { %s2106_s23 = scalar_lea.hbm %s2568_s3, 512  ;;  %s2110_s22 = scalar_lea.hbm %s2657_s10, 1024 }
 0x4f6   : > { %p2107_p1 = scmp.ne.s32.totalorder %s2568_s3, %s2106_s23  ;;  %p2111_p6 = scmp.lt.s32.totalorder %s2568_s3, %s2657_s10 }
 0x4f7   : > { %p2112_p12 = scmp.lt.s32.totalorder %s2110_s22, %s2106_s23 }
 0x4f8   : > { %p2108_p8 = pnand %p2107_p1, %p2390_p5 }
 0x4f9   : > { %p2113_p0 = por %p2112_p12, %p2111_p6 }
 0x4fa   : > { %p2109_p7 = pneg %p2108_p8 }
 0x4fc   : > { %p2114_p3 = pnand %p2113_p0, %p2109_p7 }
 0x4fe   : > { %2117 = shalt.err (!%p2114_p3)
}
 0x4ff   : > { %s2237_s29 = smov 128   ;;  %v1709_v42 = vld [vmem:[%s2655_s8] ss:$0 sm:$0xff]  ;;  %s1713_s30 = sshll.u32 %s2206_s16, 7 }
 0x500   : > { %1840 = dma.vmem_to_hbm [thread:$0]  (%p2390_p5), %s2570_s13, 512, %s2568_s3, %s1465_s24, %s2237_s29, %s2237_s29, %s2233_s21  }
 0x501   : > { %s488_s27 = scalar_lea.vmem [#allocation11], %s2438_s28  ;;  %s2688_s19 = sld [smem:[#allocation27_spill]] }
 0x502   : > { %s1479_s7 = sshll.u32 %s488_s27, 4  ;;  %s1460_s25 = scalar_lea.sflag [#allocation4], %s2435_s5  ;;  %s1480_s7 = int_to_ptr.vmem [resolvable:$true] %s1479_s7 }
 0x503   : > { %s2118_s21 = scalar_lea.vmem %s1480_s7, 128  ;;  %s2238_s16 = smov [#allocation11]  }
 0x504   : > { %p2119_p10 = scmp.ne.s32.totalorder %s1480_s7, %s2118_s21  ;;  %s2122_s28 = sshll.u32 %s2238_s16, 4  ;;  %s2123_s28 = int_to_ptr.vmem [resolvable:$false] %s2122_s28 }
 0x505   : > { %s2124_s13 = scalar_lea.vmem %s2123_s28, 256  ;;  %p2125_p13 = scmp.lt.s32.totalorder %s1480_s7, %s2123_s28 }
 0x506   : > { %p2120_p11 = pnand %p2119_p10, %p2390_p5  ;;  %p2126_p2 = scmp.lt.s32.totalorder %s2124_s13, %s2118_s21 }
 0x507   : > { %s2604_s22 = scalar_lea.hbm %s2688_s19, %s1713_s30 }
 0x508   : > { %p2121_p9 = pneg %p2120_p11  ;;  %p2127_p4 = por %p2126_p2, %p2125_p13 }
 0x50a   : > { %p2128_p1 = pnand %p2127_p4, %p2121_p9 }
 0x5b3   : > { %v1454_v43 = vpop.f32.mrf.mxu0 }
 0x5b4   : > { %v1455_v44 = vadd.f32 %v1709_v42, %v1454_v43 }
 0x5b5   : > { %v1822_v45 = vpop.f32.mrf.mxu0 }
 0x5b6   : > { %1458 = vst.msk [vmem:[%s488_s27] sm:$0xff] %vm512_vm1, %v1455_v44 }
 0x5b7   : > { %2131 = shalt.err (!%p2128_p1)
}
 0x5b8   : > { %s2132_s3 = scalar_lea.hbm %s2604_s22, 128  ;;  %s2136_s9 = scalar_lea.hbm %s2688_s19, 256 }
 0x5b9   : > { %p2133_p8 = scmp.ne.s32.totalorder %s2604_s22, %s2132_s3  ;;  %p2137_p12 = scmp.lt.s32.totalorder %s2604_s22, %s2688_s19 }
 0x5ba   : > { %p2138_p0 = scmp.lt.s32.totalorder %s2136_s9, %s2132_s3 }
 0x5bb   : > { %p2134_p7 = pnand %p2133_p8, %p2390_p5 }
 0x5bc   : > { %p2139_p3 = por %p2138_p0, %p2137_p12 }
 0x5bd   : > { %p2135_p6 = pneg %p2134_p7 }
 0x5bf   : > { %p2140_p10 = pnand %p2139_p3, %p2135_p6 }
 0x5c1   : > { %2143 = shalt.err (!%p2140_p10)
}
 0x5c2   : > { %1839 = dma.vmem_to_hbm [thread:$0]  (%p2390_p5), %s1480_s7, 128, %s2604_s22, %s1460_s25  }
 0x5c3 PF: > { %s2689_s0 = sld [smem:[#allocation20_spill]]  ;;  %p2692_p9 = scmp.ge.s32.totalorder %s2214_s18, 2 }
 0x5c4   : > { %s2690_s30 = sld [smem:[#allocation21_spill]] }
 0x5c9   : > { %s1508_s27 = sand.u32 1, %s2689_s0  }
 0x5ca   : > { %p2691_p11 = scmp.ne.s32.totalorder %s2690_s30, 0  ;;  %s1509_s23 = scalar_lea.sflag [#allocation4], %s1508_s27 }
 0x5cc   : > { %p1861_p13 = pnand %p2692_p9, %p2691_p11 }
 0x5ce   : > { %p1862_p2 = pneg %p1861_p13 }
 0x5d0   : > { %2185 = dma.done.wait (%p1862_p2), %s1509_s23, 128  }
 0x5d1   : > { %2187 = vsyncadd (%p1862_p2), %s1509_s23, 4294967168  ;;  %s1518_s11 = scalar_lea.sflag [#allocation13], %s1508_s27 }
 0x5d2   : > { %2189 = dma.done.wait (%p1862_p2), %s1518_s11, 512  }
 0x5d3   : > { %2191 = vsyncadd (%p1862_p2), %s1518_s11, 4294966784  ;;  %s34_s18 = sadd.s32 1, %s2214_s18   ;;  %s2693_s26 = sld [smem:[#allocation22_spill]] }
 0x5d4   : > { %p31_p4 = scmp.ge.s32.totalorder %s34_s18, 4   ;;  %s2694_s13 = smov %s2198_s14 }
 0x5d5   : > { %s2695_s14 = smov %s2202_s15  ;;  %s2696_s15 = smov %s2402_s20 }
 0x5d6   : > { %s2697_s16 = smov %s2210_s17  ;;  %33 = sbr.rel (!%p31_p4) target bundleno = 17 (0x11), region = 149 }
 0x5d9   : > { %s2698_s17 = smov %s2693_s26 }
 0x5db   :  { %1523 = vsyncpa [#allocation3], 1 }
 0x5dc   :  { %1525 = vsyncpa [#allocation3 + $0x1], 1 }
 0x5dd   :  { %1526 = vsyncpa [#allocation6], 1 }
 0x5de   :  { %1528 = vsyncpa [#allocation6 + $0x1], 1 }
 0x5df   :  { %1529 = vsyncpa [#allocation9], 1 }
 0x5e0   :  { %1530 = vsyncpa [#allocation4], 1 }
 0x5e1   :  { %1532 = vsyncpa [#allocation4 + $0x1], 1 }
 0x5e2   :  { %1533 = vsyncpa [#allocation13], 1 }
 0x5e3   :  { %1535 = vsyncpa [#allocation13 + $0x1], 1 }

</bundles_post_ra>
